<compile_context>
chip_gen: v7x
topology: tpu7x:2x2x1
jax: 0.10.0
libtpu: 0.0.40
codegen_flags: <defaults>
</compile_context>

<pallas_src>
import functools

import jax
import jax.numpy as jnp
from jax.experimental import pallas as pl
from jax.experimental.pallas import tpu as pltpu


def _ridge_fwd_kernel(x_ref, w_ref, b_ref, o_ref, acc_ref):
    # x_ref: (TN, TD), w_ref: (TD, Cp)  [already transposed], b_ref: (1, Cp) f32
    k = pl.program_id(1)

    @pl.when(k == 0)
    def _():
        acc_ref[...] = jnp.zeros_like(acc_ref)

    acc_ref[...] += jnp.dot(x_ref[...], w_ref[...],
                            preferred_element_type=jnp.float32)

    @pl.when(k == pl.num_programs(1) - 1)
    def _():
        o_ref[...] = (acc_ref[...] + b_ref[...]).astype(o_ref.dtype)


def _round_up(v, m):
    return ((v + m - 1) // m) * m


@functools.partial(jax.jit, static_argnames=("tn", "tk", "force_pallas"))
def ridge_forward(x, weight, b, *, tn=512, tk=2048, force_pallas=False):
    """x: (N, D), weight: (d, D) (PyTorch nn.Linear layout), b: (1, d) f32
    intercept -> (N, d) in x.dtype."""
    N, D = x.shape
    C = weight.shape[0]

    # Tiny problems: pallas_call fixed overhead (pads, dispatch, ~0.35us/step)
    # dwarfs the sub-microsecond compute; let XLA fuse a plain dot.
    if not force_pallas and (N * D * C) < (1 << 20):
        acc = jnp.dot(x, weight.T.astype(x.dtype),
                      preferred_element_type=jnp.float32)
        return (acc + b.reshape(1, C).astype(jnp.float32)).astype(x.dtype)

    # Lane-dense class dim; skip pad + post-slice when already 128-aligned.
    Cp = C if C % 128 == 0 else _round_up(C, 128)

    # Weight: fuse transpose (+ pad + optional bf16 cast) into one materializing
    # copy -> (D, Cp). Canonical MXU feed; weight stays resident when n_k == 1.
    w_t = weight.astype(x.dtype).T                       # (D, C)
    if Cp != C:
        w_t = jnp.pad(w_t, ((0, 0), (0, Cp - C)))
    b_row = b.reshape(1, C).astype(jnp.float32)
    if Cp != C:
        b_row = jnp.pad(b_row, ((0, 0), (0, Cp - C)))

    # Row (N) tiling: dtype-aware sublane granularity; never pad X; guarantee
    # >= 2 tiles whenever possible so v7x's two TCs share the "parallel" axis.
    g = max(8, 32 // jnp.dtype(x.dtype).itemsize)        # f32->8, bf16->16
    TN = min(tn, max(g, _round_up(pl.cdiv(N, 2), g)))
    n_n = pl.cdiv(N, TN)

    # Feature (K) tiling: whole D when small, else largest multiple-of-128
    # divisor of D under `tk` (keeps resident tiles within v7x's VMEM budget
    # without padding the contraction axis).
    TD = D
    if D > tk:
        for cand in range(tk - tk % 128, 127, -128):
            if D % cand == 0:
                TD = cand
                break
    n_k = D // TD

    out_p = pl.pallas_call(
        _ridge_fwd_kernel,
        out_shape=jax.ShapeDtypeStruct((N, Cp), x.dtype),
        grid_spec=pltpu.PrefetchScalarGridSpec(
            num_scalar_prefetch=0,
            grid=(n_n, n_k),
            in_specs=[
                pl.BlockSpec((TN, TD), lambda i, k: (i, k)),   # X tile (streams)
                pl.BlockSpec((TD, Cp), lambda i, k: (k, 0)),   # W^T (resident if n_k==1)
                pl.BlockSpec((1, Cp), lambda i, k: (0, 0)),    # intercept (resident)
            ],
            out_specs=pl.BlockSpec((TN, Cp), lambda i, k: (i, 0)),
            scratch_shapes=[pltpu.VMEM((TN, Cp), jnp.float32)],
        ),
        compiler_params=pltpu.CompilerParams(
            dimension_semantics=("parallel", "arbitrary"),
            vmem_limit_bytes=48 * 1024 * 1024,
        ),
    )(x, w_t, b_row)

    return out_p if Cp == C else out_p[:, :C]


def ridge_fit(X, y, l2_reg=0.001):
    """Plain-JAX replica of RidgeModule.fit (host-side closed-form solve).
    Returns (weight (d, D), b (1, d)) as used by forward."""
    # TODO(synk): the closed-form ridge solve is host-side linear algebra, not a kernel.
    X_mean = X.mean(axis=0, keepdims=True)
    y_mean = y.mean(axis=0, keepdims=True)
    y_std = jnp.clip(y.std(axis=0, keepdims=True, ddof=1), 1e-6, None)
    Xc = X - X_mean
    yn = (y - y_mean) / y_std
    N, D = X.shape
    A = Xc.T @ Xc + l2_reg * N * jnp.eye(D, dtype=X.dtype)
    B = Xc.T @ yn
    W = jnp.linalg.solve(A, B).T          # (d, D)
    W = W * y_std.T                       # un-normalize
    b = y_mean - X_mean @ W.T             # (1, d)
    return W, b


if __name__ == "__main__":
    key = jax.random.PRNGKey(0)
    k_x, k_y, k_x2, k_w2, k_b2 = jax.random.split(key, 5)

    # --- 1) RidgeModule-sized demo: fit + forward (grid = (2, 1), Cp = 128) ---
    N, D, d = 16, 32, 4
    X = jax.random.normal(k_x, (N, D), dtype=jnp.float32)
    y = jax.random.normal(k_y, (N, d), dtype=jnp.float32)
    weight, b = ridge_fit(X, y, l2_reg=0.001)

    out = ridge_forward(X, weight, b, force_pallas=True)   # exercise the Pallas path
    jax.block_until_ready(out)
    ref = X @ weight.T + b
    assert out.shape == (N, d)
    assert jnp.allclose(out, ref, atol=1e-4, rtol=1e-4)

    # small-shape fallback path (fused XLA dot) stays consistent
    out_fb = ridge_forward(X, weight, b)
    jax.block_until_ready(out_fb)
    assert jnp.allclose(out_fb, ref, atol=1e-4, rtol=1e-4)

    # --- 2) K-tiled path (D split on the "arbitrary" axis) + ragged N (no X pad) ---
    N2, D2, d2 = 72, 256, 4
    X2 = jax.random.normal(k_x2, (N2, D2), dtype=jnp.float32)
    W2 = jax.random.normal(k_w2, (d2, D2), dtype=jnp.float32) * 0.05
    b2 = jax.random.normal(k_b2, (1, d2), dtype=jnp.float32)
    out2 = ridge_forward(X2, W2, b2, tk=128, force_pallas=True)
    jax.block_until_ready(out2)
    ref2 = X2 @ W2.T + b2
    assert out2.shape == (N2, d2)
    assert jnp.allclose(out2, ref2, atol=1e-2, rtol=1e-2)

    # --- 3) bf16 input path (halves X HBM traffic; f32 accumulation + bias) ---
    Xb = X.astype(jnp.bfloat16)
    outb = ridge_forward(Xb, weight, b, force_pallas=True)
    jax.block_until_ready(outb)
    refb = (Xb.astype(jnp.float32)
            @ weight.astype(jnp.bfloat16).astype(jnp.float32).T) + b
    assert outb.dtype == jnp.bfloat16
    assert jnp.allclose(outb.astype(jnp.float32), refb, atol=5e-2, rtol=5e-2)

    print("KERNEL_OK")
</pallas_src>

<mosaic_0001>
module attributes {stable_mosaic.version = 11 : i64} {
  func.func @_ridge_fwd_kernel(%arg0: i32, %arg1: i32, %arg2: memref<8x32xf32, #tpu.memory_space<vmem>>, %arg3: memref<32x128xf32, #tpu.memory_space<vmem>>, %arg4: memref<1x128xf32, #tpu.memory_space<vmem>>, %arg5: memref<8x128xf32, #tpu.memory_space<vmem>>, %arg6: memref<8x128xf32, #tpu.memory_space<vmem>>) attributes {dimension_semantics = [#tpu.dimension_semantics<parallel>, #tpu.dimension_semantics<arbitrary>], iteration_bounds = array<i64: 2, 1>, scalar_prefetch = 0 : i64, scratch_operands = 1 : i64, tpu.core_type = #tpu.core_type<tc>, window_params = [{transform_indices = @transform_0, window_bounds = array<i64: 8, 32>}, {transform_indices = @transform_1, window_bounds = array<i64: 32, 128>}, {pipeline_mode = #tpu.pipeline_mode<synchronous>, transform_indices = @transform_2, window_bounds = array<i64: 1, 128>}, {transform_indices = @transform_3, window_bounds = array<i64: 8, 128>}]} {
    %c0_i32 = arith.constant 0 : i32
    %0 = arith.cmpi eq, %arg1, %c0_i32 : i32
    %1 = arith.extui %0 : i1 to i32
    %c0_i32_0 = arith.constant 0 : i32
    %2 = arith.cmpi ne, %1, %c0_i32_0 : i32
    scf.if %2 {
      %cst_10 = arith.constant 0.000000e+00 : f32
      %12 = vector.broadcast %cst_10 : f32 to vector<8x128xf32>
      %c0_11 = arith.constant 0 : index
      %c0_12 = arith.constant 0 : index
      %13 = vector.load %arg6[%c0_11, %c0_12] : memref<8x128xf32, #tpu.memory_space<vmem>>, vector<8x128xf32>
      tpu.vector_store %arg6[%c0_11, %c0_12], %12 {strides = array<i32>} : memref<8x128xf32, #tpu.memory_space<vmem>>, vector<8x128xf32>,
    } else {
    }
    %c0 = arith.constant 0 : index
    %c0_1 = arith.constant 0 : index
    %3 = vector.load %arg6[%c0, %c0_1] : memref<8x128xf32, #tpu.memory_space<vmem>>, vector<8x128xf32>
    %c0_2 = arith.constant 0 : index
    %c0_3 = arith.constant 0 : index
    %4 = vector.load %arg2[%c0_2, %c0_3] : memref<8x32xf32, #tpu.memory_space<vmem>>, vector<8x32xf32>
    %c0_4 = arith.constant 0 : index
    %c0_5 = arith.constant 0 : index
    %5 = vector.load %arg3[%c0_4, %c0_5] : memref<32x128xf32, #tpu.memory_space<vmem>>, vector<32x128xf32>
    %cst = arith.constant dense<0.000000e+00> : vector<8x128xf32>
    %6 = tpu.matmul %4, %5, %cst {dimension_numbers = #tpu.dot_dimension_numbers<[1], [0], [0], [1], [0, 0, 1, 1], [], []>} : vector<8x32xf32>, vector<32x128xf32>, vector<8x128xf32> -> vector<8x128xf32>
    %7 = arith.addf %3, %6 : vector<8x128xf32>
    %c0_6 = arith.constant 0 : index
    %c0_7 = arith.constant 0 : index
    %8 = vector.load %arg6[%c0_6, %c0_7] : memref<8x128xf32, #tpu.memory_space<vmem>>, vector<8x128xf32>
    tpu.vector_store %arg6[%c0_6, %c0_7], %7 {strides = array<i32>} : memref<8x128xf32, #tpu.memory_space<vmem>>, vector<8x128xf32>,
    %c0_i32_8 = arith.constant 0 : i32
    %9 = arith.cmpi eq, %arg1, %c0_i32_8 : i32
    %10 = arith.extui %9 : i1 to i32
    %c0_i32_9 = arith.constant 0 : i32
    %11 = arith.cmpi ne, %10, %c0_i32_9 : i32
    scf.if %11 {
      %c0_10 = arith.constant 0 : index
      %c0_11 = arith.constant 0 : index
      %12 = vector.load %arg6[%c0_10, %c0_11] : memref<8x128xf32, #tpu.memory_space<vmem>>, vector<8x128xf32>
      %c0_12 = arith.constant 0 : index
      %c0_13 = arith.constant 0 : index
      %13 = vector.load %arg4[%c0_12, %c0_13] : memref<1x128xf32, #tpu.memory_space<vmem>>, vector<1x128xf32>
      %14 = vector.broadcast %13 : vector<1x128xf32> to vector<8x128xf32>
      %15 = arith.addf %12, %14 : vector<8x128xf32>
      %c0_14 = arith.constant 0 : index
      %c0_15 = arith.constant 0 : index
      %16 = vector.load %arg5[%c0_14, %c0_15] : memref<8x128xf32, #tpu.memory_space<vmem>>, vector<8x128xf32>
      tpu.vector_store %arg5[%c0_14, %c0_15], %15 {strides = array<i32>} : memref<8x128xf32, #tpu.memory_space<vmem>>, vector<8x128xf32>,
    } else {
    }
    return
  }
  func.func @transform_0(%arg0: i32, %arg1: i32) -> (i32, i32) {
    %c0_i32 = arith.constant 0 : i32
    return %arg0, %arg1 : i32, i32
  }
  func.func @transform_1(%arg0: i32, %arg1: i32) -> (i32, i32) {
    %c0_i32 = arith.constant 0 : i32
    %c0_i32_0 = arith.constant 0 : i32
    return %arg1, %c0_i32 : i32, i32
  }
  func.func @transform_2(%arg0: i32, %arg1: i32) -> (i32, i32) {
    %c0_i32 = arith.constant 0 : i32
    %c0_i32_0 = arith.constant 0 : i32
    %c0_i32_1 = arith.constant 0 : i32
    return %c0_i32, %c0_i32_0 : i32, i32
  }
  func.func @transform_3(%arg0: i32, %arg1: i32) -> (i32, i32) {
    %c0_i32 = arith.constant 0 : i32
    %c0_i32_0 = arith.constant 0 : i32
    return %arg0, %c0_i32 : i32, i32
  }
}

</mosaic_0001>

<bundles_post_ra>
// kernel: ridge_forward.1
= control target key start
LH: loop header
LB: loop body
LE: loop exit
PB: predicated region body
PF: predicated region fallthrough
CT: control target
= control target key end

     0   :  { %s499_s12 = smov 0   ;;  %s501_s13 = smov 0   ;;  %s547_s0 = inlined_call_operand.vmem [shape: f32[16,32], index: 0, kind: input, shape index: {}]   ;;  %s548_s1 = inlined_call_operand.vmem [shape: f32[32,128], index: 1, kind: input, shape index: {}]   ;;  %s549_s2 = inlined_call_operand.vmem [shape: f32[1,128], index: 2, kind: input, shape index: {}]   ;;  %s550_s3 = inlined_call_operand.vmem [shape: f32[16,128], index: 3, kind: output, shape index: {}]  }
   0x1   :  { %s503_s14 = smov 0  }
   0x2 LB: > { %s25_s15 = sadd.s32 1, %s470_s13  ;;  %p396_p0 = scmp.ge.s32.totalorder %s474_s14, 1  ;;  %s474_s14 = sphi %s503_s14, %s13_s14   ;;  %s470_s13 = sphi %s501_s13, %s552_s13   ;;  %s466_s12 = sphi %s499_s12, %s551_s12  }
   0x3   : > { %p27_p1 = scmp.ge.s32.totalorder %s25_s15, 2  ;;  %p164_p2 = scmp.lt.s32.totalorder %s474_s14, 3 }
   0x5   : > { %s554_s15 = smov (%p27_p1, %s25_s15), 0  ;;  %p165_p3 = pnand %p396_p0, %p164_p2 }
   0x6   : > { %v218_v0 = vld [vmem:[%s548_s1] sm:$0xff] (!%p165_p3)  ;;  %v219_v1 = vld [vmem:[%s548_s1 + $0x8] sm:$0xff] (!%p165_p3)  ;;  %v220_v2 = vld [vmem:[%s548_s1 + $0x10] sm:$0xff] (!%p165_p3)  ;;  %v476_v3 = vmov (!%p165_p3), 0.0|0.0   ;;  %vm477_vm0 = vmmov (!%p165_p3), 0   ;;  %v478_v6 = vmov (!%p165_p3), 0.0  }
   0x7   : > { %168 = sbr.rel (%p165_p3) target bundleno = 233 (0xe9), region = 32  ;;  %419 = vmatprep.subr.bf16.mxu0 (!%p165_p3), %v476_v3  ;;  %v420_v4 = vpack.c.bf16 (!%p165_p3), %v219_v1, %v218_v0  ;;  %v221_v5 = vld [vmem:[%s548_s1 + $0x18] sm:$0xff] (!%p165_p3)  ;;  %416 = vmatprep.mubr.msk.f32.mxu0 (!%p165_p3), %vm477_vm0, %v478_v6  ;;  %p194_p4 = scmp.lt.s32.totalorder (!%p165_p3), %s466_s12, 1  ;;  %vm222_vm1 = vcmask (!%p165_p3), 261120   ;;  %v400_v9 = vld [vmem:[%s549_s2] ss:$0 sm:$0xff] (!%p165_p3) }
   0x8   : > { %v423_v7 = vpack.c.bf16 (!%p165_p3), %v221_v5, %v220_v2 }
   0x9   : > { %421 = vmatpush3.bf16.msra.mxu0 (!%p165_p3), %v420_v4 }
   0xa   : > { %422 = vmatprep.subr.bf16.mxu0 (!%p165_p3), %v476_v3 }
   0xd   : > { %424 = vmatpush3.bf16.msra.mxu0 (!%p165_p3), %v423_v7 }
   0xe   : > { %s556_s12 = smov (!%p194_p4, %s466_s12), 1 }
   0xf   : > { %s397_s24 = sshll.u32 %s556_s12, 3 }
  0x10   : > { %s200_s27 = scalar_lea.vmem %s547_s0, %s397_s24  ;;  %s210_s5 = scalar_lea.vmem %s550_s3, %s397_s24 }
  0x11   : > { %v217_v8 = vld [vmem:[%s200_s27] sm:$0xff] }
  0x12   : > { %417 = vmatmul.mubr.msk.f32.vlgmr.msra.gmra.mrb[0].mxu0 %vm222_vm1, %v217_v8 }
  0xe5   : > { %v292_v10 = vpop.f32.mrb[0].mxu0 }
  0xe6   : > { %v309_v11 = vadd.f32 %v400_v9, %v292_v10  ;;  %v418_v12 = vpop.f32.mrb[1].mxu0 }
  0xe8   : > { %310 = vst [vmem:[%s210_s5] sm:$0xff] %v309_v11 }
  0xe9 PF: > { %s13_s14 = sadd.s32 1, %s474_s14   ;;  %s551_s12 = smov %s470_s13 }
  0xea   : > { %p10_p5 = scmp.ge.s32.totalorder %s13_s14, 4   ;;  %s552_s13 = smov %s554_s15 }
  0xec   :  { %12 = sbr.rel (!%p10_p5) target bundleno = 2 (0x2), region = 73 }

</bundles_post_ra>
